<compile_context>
chip_gen: v6e
topology: v6e:2x2x1
jax: 0.10.0
libtpu: 0.0.40
codegen_flags: <defaults>
</compile_context>

<pallas_src>
import jax
import jax.numpy as jnp
from jax.experimental import pallas as pl
from jax.experimental.pallas import tpu as pltpu


def _round_up(n, m):
    return ((n + m - 1) // m) * m


def _mlp_kernel(x_ref,
                w1_ref, b1_ref,
                w2_ref, b2_ref,
                w3_ref, b3_ref,
                w4_ref, b4_ref,
                o_ref):
    # x_ref is already (F, TB) bf16 ("batch-in-lanes"): lane-dense, no transpose.
    # fc1 -> ReLU   (dropout = identity in eval mode)
    h = jnp.dot(w1_ref[...], x_ref[...],
                preferred_element_type=jnp.float32)                     # (64, TB) f32
    h = jnp.maximum(h + b1_ref[...], 0.0)
    # fc2 -> ReLU
    h = jnp.dot(w2_ref[...], h.astype(jnp.bfloat16),
                preferred_element_type=jnp.float32)                     # (32, TB)
    h = jnp.maximum(h + b2_ref[...], 0.0)
    # fc3 -> ReLU
    h = jnp.dot(w3_ref[...], h.astype(jnp.bfloat16),
                preferred_element_type=jnp.float32)                     # (16, TB)
    h = jnp.maximum(h + b3_ref[...], 0.0)
    # fc4 (16 -> 1): N=1 matmul would waste an MXU pass; VPU mul + sublane reduce.
    z = jnp.sum(h * w4_ref[...], axis=0, keepdims=True) + b4_ref[0, 0]  # (1, TB)
    # Sigmoid: exp on EUP + approximate reciprocal on EUP; clamp to [0, 1].
    p = pl.reciprocal(1.0 + jnp.exp(-z), approx=True)
    o_ref[...] = jnp.clip(p, 0.0, 1.0).astype(o_ref.dtype)


def binary_classifier_forward(x, params, *, block_b=4096):
    """x: [B, F] float32.  params: dict of (w, b) per layer in PyTorch layout
    (w: [out, in], b: [out])."""
    B, F = x.shape
    (w1, b1), (w2, b2), (w3, b3), (w4, b4) = (
        params["fc1"], params["fc2"], params["fc3"], params["fc4"])
    H1, H2, H3 = w1.shape[0], w2.shape[0], w3.shape[0]   # 64, 32, 16

    # Batch tile: multiple of 128 (lane-dense output); capped at ceil(B/2)
    # rounded to 128 so grids of >= 2 steps shard across v7x's 2 TensorCores.
    TB = min(block_b, max(128, _round_up(-(-B // 2), 128)))
    B_pad = _round_up(B, TB)
    if B_pad != B:
        x = jnp.pad(x, ((0, B_pad - B), (0, 0)))

    # Pre-transpose once in XLA (wrapper) -> (F, B_pad) bf16: kills the per-step
    # in-kernel XLU transpose and the lane-padded (TB, F) tile.
    x_t = x.T.astype(jnp.bfloat16)                        # (F, B_pad)

    # bf16 matmul operands (halves x DMA bytes and MXU passes); f32 elsewhere.
    w1_bf = w1.astype(jnp.bfloat16)
    w2_bf = w2.astype(jnp.bfloat16)
    w3_bf = w3.astype(jnp.bfloat16)
    b1c = b1.reshape(H1, 1).astype(jnp.float32)
    b2c = b2.reshape(H2, 1).astype(jnp.float32)
    b3c = b3.reshape(H3, 1).astype(jnp.float32)
    w4c = w4.reshape(H3, 1).astype(jnp.float32)           # column for the VPU reduce
    b4s = b4.reshape(1, 1).astype(jnp.float32)            # scalar -> SMEM

    grid = (B_pad // TB,)

    def resident(shape):
        return pl.BlockSpec(shape, lambda i: (0, 0))      # DMA once, stays resident

    flops = 2 * B_pad * (F * H1 + H1 * H2 + H2 * H3 + H3)
    bytes_accessed = (
        int(x_t.size) * 2 + B_pad * 4
        + sum(int(a.size) * a.dtype.itemsize
              for a in (w1_bf, b1c, w2_bf, b2c, w3_bf, b3c, w4c, b4s)))

    out = pl.pallas_call(
        _mlp_kernel,
        out_shape=jax.ShapeDtypeStruct((1, B_pad), jnp.float32),
        grid=grid,
        in_specs=[
            # x tile, pipelined per grid step (double-buffered).
            # v5e-only option if DMA ever shows: pipeline_mode=pl.Buffered(3).
            pl.BlockSpec((F, TB), lambda i: (0, i)),
            resident((H1, F)), resident((H1, 1)),
            resident((H2, H1)), resident((H2, 1)),
            resident((H3, H2)), resident((H3, 1)),
            resident((H3, 1)),
            pl.BlockSpec(memory_space=pltpu.MemorySpace.SMEM),   # b4 scalar
        ],
        out_specs=pl.BlockSpec((1, TB), lambda i: (0, i)),        # lane-dense output
        compiler_params=pltpu.CompilerParams(
            dimension_semantics=("parallel",),
            vmem_limit_bytes=32 * 1024 * 1024),
        cost_estimate=pl.CostEstimate(
            flops=flops, transcendentals=B_pad, bytes_accessed=bytes_accessed),
    )(x_t, w1_bf, b1c, w2_bf, b2c, w3_bf, b3c, w4c, b4s)

    return out.reshape(B_pad, 1)[:B]


def init_params(key, input_size):
    """Deterministic init matching nn.Linear default: U(-1/sqrt(in), 1/sqrt(in)).
    Weights in PyTorch layout [out, in], biases [out]."""
    dims = [(input_size, 64), (64, 32), (32, 16), (16, 1)]
    names = ["fc1", "fc2", "fc3", "fc4"]
    params = {}
    for name, (fan_in, fan_out) in zip(names, dims):
        key, kw, kb = jax.random.split(key, 3)
        bound = 1.0 / (fan_in ** 0.5)
        w = jax.random.uniform(kw, (fan_out, fan_in), jnp.float32, -bound, bound)
        b = jax.random.uniform(kb, (fan_out,), jnp.float32, -bound, bound)
        params[name] = (w, b)
    return params


def _reference_forward(x, params):
    h = x
    for name in ["fc1", "fc2", "fc3"]:
        w, b = params[name]
        h = jnp.maximum(h @ w.T + b, 0.0)
    w, b = params["fc4"]
    return jax.nn.sigmoid(h @ w.T + b)


if __name__ == "__main__":
    key = jax.random.PRNGKey(0)
    batch, input_size = 8, 32  # small shapes consistent with the module

    k_x, k_p = jax.random.split(key)
    x = jax.random.normal(k_x, (batch, input_size), dtype=jnp.float32)
    params = init_params(k_p, input_size)

    out = binary_classifier_forward(x, params)
    out = jax.block_until_ready(out)

    ref = _reference_forward(x, params)
    assert out.shape == (batch, 1)
    # bf16 matmul operands + approx reciprocal -> loosened tolerance vs f32 reference.
    assert jnp.allclose(out, ref, atol=2e-2, rtol=2e-2), "mismatch vs reference"

    print("KERNEL_OK")
</pallas_src>

<mosaic_0001>
module attributes {stable_mosaic.version = 11 : i64} {
  func.func @_mlp_kernel(%arg0: i32, %arg1: memref<32x128xbf16, #tpu.memory_space<vmem>>, %arg2: memref<64x32xbf16, #tpu.memory_space<vmem>>, %arg3: memref<64x1xf32, #tpu.memory_space<vmem>>, %arg4: memref<32x64xbf16, #tpu.memory_space<vmem>>, %arg5: memref<32x1xf32, #tpu.memory_space<vmem>>, %arg6: memref<16x32xbf16, #tpu.memory_space<vmem>>, %arg7: memref<16x1xf32, #tpu.memory_space<vmem>>, %arg8: memref<16x1xf32, #tpu.memory_space<vmem>>, %arg9: memref<1x1xf32, #tpu.memory_space<smem>>, %arg10: memref<1x128xf32, #tpu.memory_space<vmem>>) attributes {dimension_semantics = [#tpu.dimension_semantics<parallel>], iteration_bounds = array<i64: 1>, scalar_prefetch = 0 : i64, scratch_operands = 0 : i64, tpu.core_type = #tpu.core_type<tc>, window_params = [{transform_indices = @transform_0, window_bounds = array<i64: 32, 128>}, {pipeline_mode = #tpu.pipeline_mode<synchronous>, transform_indices = @transform_1, window_bounds = array<i64: 64, 32>}, {pipeline_mode = #tpu.pipeline_mode<synchronous>, transform_indices = @transform_2, window_bounds = array<i64: 64, 1>}, {pipeline_mode = #tpu.pipeline_mode<synchronous>, transform_indices = @transform_3, window_bounds = array<i64: 32, 64>}, {pipeline_mode = #tpu.pipeline_mode<synchronous>, transform_indices = @transform_4, window_bounds = array<i64: 32, 1>}, {pipeline_mode = #tpu.pipeline_mode<synchronous>, transform_indices = @transform_5, window_bounds = array<i64: 16, 32>}, {pipeline_mode = #tpu.pipeline_mode<synchronous>, transform_indices = @transform_6, window_bounds = array<i64: 16, 1>}, {pipeline_mode = #tpu.pipeline_mode<synchronous>, transform_indices = @transform_7, window_bounds = array<i64: 16, 1>}, {transform_indices = @transform_8, window_bounds = array<i64: 1, 1>}, {transform_indices = @transform_9, window_bounds = array<i64: 1, 128>}]} {
    %c0 = arith.constant 0 : index
    %c0_0 = arith.constant 0 : index
    %0 = vector.load %arg2[%c0, %c0_0] : memref<64x32xbf16, #tpu.memory_space<vmem>>, vector<64x32xbf16>
    %c0_1 = arith.constant 0 : index
    %c0_2 = arith.constant 0 : index
    %1 = vector.load %arg1[%c0_1, %c0_2] : memref<32x128xbf16, #tpu.memory_space<vmem>>, vector<32x128xbf16>
    %cst = arith.constant dense<0.000000e+00> : vector<64x128xf32>
    %2 = tpu.matmul %0, %1, %cst {dimension_numbers = #tpu.dot_dimension_numbers<[1], [0], [0], [1], [0, 0, 1, 1], [], []>} : vector<64x32xbf16>, vector<32x128xbf16>, vector<64x128xf32> -> vector<64x128xf32>
    %c0_3 = arith.constant 0 : index
    %c0_4 = arith.constant 0 : index
    %3 = vector.load %arg3[%c0_3, %c0_4] : memref<64x1xf32, #tpu.memory_space<vmem>>, vector<64x1xf32>
    %4 = vector.broadcast %3 : vector<64x1xf32> to vector<64x128xf32>
    %5 = arith.addf %2, %4 : vector<64x128xf32>
    %cst_5 = arith.constant 0.000000e+00 : f32
    %6 = vector.broadcast %cst_5 : f32 to vector<64x128xf32>
    %7 = arith.maximumf %5, %6 : vector<64x128xf32>
    %c0_6 = arith.constant 0 : index
    %c0_7 = arith.constant 0 : index
    %8 = vector.load %arg4[%c0_6, %c0_7] : memref<32x64xbf16, #tpu.memory_space<vmem>>, vector<32x64xbf16>
    %9 = arith.truncf %7 : vector<64x128xf32> to vector<64x128xbf16>
    %cst_8 = arith.constant dense<0.000000e+00> : vector<32x128xf32>
    %10 = tpu.matmul %8, %9, %cst_8 {dimension_numbers = #tpu.dot_dimension_numbers<[1], [0], [0], [1], [0, 0, 1, 1], [], []>} : vector<32x64xbf16>, vector<64x128xbf16>, vector<32x128xf32> -> vector<32x128xf32>
    %c0_9 = arith.constant 0 : index
    %c0_10 = arith.constant 0 : index
    %11 = vector.load %arg5[%c0_9, %c0_10] : memref<32x1xf32, #tpu.memory_space<vmem>>, vector<32x1xf32>
    %12 = vector.broadcast %11 : vector<32x1xf32> to vector<32x128xf32>
    %13 = arith.addf %10, %12 : vector<32x128xf32>
    %cst_11 = arith.constant 0.000000e+00 : f32
    %14 = vector.broadcast %cst_11 : f32 to vector<32x128xf32>
    %15 = arith.maximumf %13, %14 : vector<32x128xf32>
    %c0_12 = arith.constant 0 : index
    %c0_13 = arith.constant 0 : index
    %16 = vector.load %arg6[%c0_12, %c0_13] : memref<16x32xbf16, #tpu.memory_space<vmem>>, vector<16x32xbf16>
    %17 = arith.truncf %15 : vector<32x128xf32> to vector<32x128xbf16>
    %cst_14 = arith.constant dense<0.000000e+00> : vector<16x128xf32>
    %18 = tpu.matmul %16, %17, %cst_14 {dimension_numbers = #tpu.dot_dimension_numbers<[1], [0], [0], [1], [0, 0, 1, 1], [], []>} : vector<16x32xbf16>, vector<32x128xbf16>, vector<16x128xf32> -> vector<16x128xf32>
    %c0_15 = arith.constant 0 : index
    %c0_16 = arith.constant 0 : index
    %19 = vector.load %arg7[%c0_15, %c0_16] : memref<16x1xf32, #tpu.memory_space<vmem>>, vector<16x1xf32>
    %20 = vector.broadcast %19 : vector<16x1xf32> to vector<16x128xf32>
    %21 = arith.addf %18, %20 : vector<16x128xf32>
    %cst_17 = arith.constant 0.000000e+00 : f32
    %22 = vector.broadcast %cst_17 : f32 to vector<16x128xf32>
    %23 = arith.maximumf %21, %22 : vector<16x128xf32>
    %c0_18 = arith.constant 0 : index
    %c0_19 = arith.constant 0 : index
    %24 = vector.load %arg8[%c0_18, %c0_19] : memref<16x1xf32, #tpu.memory_space<vmem>>, vector<16x1xf32>
    %25 = vector.broadcast %24 : vector<16x1xf32> to vector<16x128xf32>
    %26 = arith.mulf %23, %25 : vector<16x128xf32>
    %cst_20 = arith.constant dense<0.000000e+00> : vector<128xf32>
    %27 = vector.multi_reduction <add>, %26, %cst_20 [0] : vector<16x128xf32> to vector<128xf32>
    %28 = vector.shape_cast %27 : vector<128xf32> to vector<1x128xf32>
    %c0_21 = arith.constant 0 : index
    %c0_22 = arith.constant 0 : index
    %29 = memref.load %arg9[%c0_21, %c0_22] : memref<1x1xf32, #tpu.memory_space<smem>>
    %30 = vector.broadcast %29 : f32 to vector<1x128xf32>
    %31 = arith.addf %28, %30 : vector<1x128xf32>
    %cst_23 = arith.constant 0.000000e+00 : f32
    %32 = vector.broadcast %cst_23 : f32 to vector<1x128xf32>
    %33 = arith.subf %32, %31 : vector<1x128xf32>
    %34 = math.exp %33 : vector<1x128xf32>
    %cst_24 = arith.constant 1.000000e+00 : f32
    %35 = vector.broadcast %cst_24 : f32 to vector<1x128xf32>
    %36 = arith.addf %35, %34 : vector<1x128xf32>
    %37 = tpu.reciprocal %36 {approx = true} : vector<1x128xf32> -> vector<1x128xf32>
    %cst_25 = arith.constant 0.000000e+00 : f32
    %cst_26 = arith.constant 1.000000e+00 : f32
    %38 = vector.broadcast %cst_25 : f32 to vector<1x128xf32>
    %39 = arith.maximumf %38, %37 : vector<1x128xf32>
    %40 = vector.broadcast %cst_26 : f32 to vector<1x128xf32>
    %41 = arith.minimumf %40, %39 : vector<1x128xf32>
    %c0_27 = arith.constant 0 : index
    %c0_28 = arith.constant 0 : index
    %42 = vector.load %arg10[%c0_27, %c0_28] : memref<1x128xf32, #tpu.memory_space<vmem>>, vector<1x128xf32>
    tpu.vector_store %arg10[%c0_27, %c0_28], %41 {strides = array<i32>} : memref<1x128xf32, #tpu.memory_space<vmem>>, vector<1x128xf32>,
    return
  }
  func.func @transform_0(%arg0: i32) -> (i32, i32) {
    %c0_i32 = arith.constant 0 : i32
    %c0_i32_0 = arith.constant 0 : i32
    return %c0_i32, %arg0 : i32, i32
  }
  func.func @transform_1(%arg0: i32) -> (i32, i32) {
    %c0_i32 = arith.constant 0 : i32
    %c0_i32_0 = arith.constant 0 : i32
    %c0_i32_1 = arith.constant 0 : i32
    return %c0_i32, %c0_i32_0 : i32, i32
  }
  func.func @transform_2(%arg0: i32) -> (i32, i32) {
    %c0_i32 = arith.constant 0 : i32
    %c0_i32_0 = arith.constant 0 : i32
    %c0_i32_1 = arith.constant 0 : i32
    return %c0_i32, %c0_i32_0 : i32, i32
  }
  func.func @transform_3(%arg0: i32) -> (i32, i32) {
    %c0_i32 = arith.constant 0 : i32
    %c0_i32_0 = arith.constant 0 : i32
    %c0_i32_1 = arith.constant 0 : i32
    return %c0_i32, %c0_i32_0 : i32, i32
  }
  func.func @transform_4(%arg0: i32) -> (i32, i32) {
    %c0_i32 = arith.constant 0 : i32
    %c0_i32_0 = arith.constant 0 : i32
    %c0_i32_1 = arith.constant 0 : i32
    return %c0_i32, %c0_i32_0 : i32, i32
  }
  func.func @transform_5(%arg0: i32) -> (i32, i32) {
    %c0_i32 = arith.constant 0 : i32
    %c0_i32_0 = arith.constant 0 : i32
    %c0_i32_1 = arith.constant 0 : i32
    return %c0_i32, %c0_i32_0 : i32, i32
  }
  func.func @transform_6(%arg0: i32) -> (i32, i32) {
    %c0_i32 = arith.constant 0 : i32
    %c0_i32_0 = arith.constant 0 : i32
    %c0_i32_1 = arith.constant 0 : i32
    return %c0_i32, %c0_i32_0 : i32, i32
  }
  func.func @transform_7(%arg0: i32) -> (i32, i32) {
    %c0_i32 = arith.constant 0 : i32
    %c0_i32_0 = arith.constant 0 : i32
    %c0_i32_1 = arith.constant 0 : i32
    return %c0_i32, %c0_i32_0 : i32, i32
  }
  func.func @transform_8(%arg0: i32) -> (i32, i32) {
    %c0_i32 = arith.constant 0 : i32
    %c0_i32_0 = arith.constant 0 : i32
    %c0_i32_1 = arith.constant 0 : i32
    return %c0_i32, %c0_i32_0 : i32, i32
  }
  func.func @transform_9(%arg0: i32) -> (i32, i32) {
    %c0_i32 = arith.constant 0 : i32
    %c0_i32_0 = arith.constant 0 : i32
    return %c0_i32, %arg0 : i32, i32
  }
}

</mosaic_0001>

<bundles_post_ra>
// kernel: tpu_custom_call.1
= control target key start
LH: loop header
LB: loop body
LE: loop exit
PB: predicated region body
PF: predicated region fallthrough
CT: control target
= control target key end

     0   :  { %vm127_vm0 = vcmask 261120   ;;  %v532_v3 = vmov 0   ;;  %s674_s0 = inlined_call_operand.vmem [shape: bf16[32,128], index: 0, kind: input, shape index: {}]   ;;  %s675_s1 = inlined_call_operand.vmem [shape: bf16[64,32], index: 1, kind: input, shape index: {}]   ;;  %s676_s2 = inlined_call_operand.vmem [shape: f32[64,1], index: 2, kind: input, shape index: {}]   ;;  %s677_s3 = inlined_call_operand.vmem [shape: bf16[32,64], index: 3, kind: input, shape index: {}]   ;;  %s678_s4 = inlined_call_operand.vmem [shape: f32[32,1], index: 4, kind: input, shape index: {}]   ;;  %s679_s5 = inlined_call_operand.vmem [shape: bf16[16,32], index: 5, kind: input, shape index: {}]   ;;  %s680_s6 = inlined_call_operand.vmem [shape: f32[16,1], index: 6, kind: input, shape index: {}]   ;;  %s681_s7 = inlined_call_operand.vmem [shape: f32[16,1], index: 7, kind: input, shape index: {}]   ;;  %s682_s8 = inlined_call_operand.<no memory space> [shape: f32[1,1], index: 8, kind: input, shape index: {}]   ;;  %s683_s9 = inlined_call_operand.hbm [shape: f32[1,128], index: 9, kind: output, shape index: {}]  }
   0x1   :  { %v497_v0 = vld [vmem:[%s674_s0 + $0x8] sm:$0xff]   ;;  %v498_v1 = vld [vmem:[%s674_s0] sm:$0xff]   ;;  %495 = vset.pattern.permute.xlu0 %v532_v3  ;;  %496 = vset.pattern.permute.xlu1 %v532_v3  ;;  %v53_v5 = vld [vmem:[%s676_s2 + $0x30] sm:$0xff] }
   0x2   :  { %459 = vmatprep.subr.bf16.mxu0 %v497_v0  ;;  %v499_v2 = vld [vmem:[%s675_s1] sm:$0xff]   ;;  %v500_v4 = vld [vmem:[%s675_s1 + $0x8] sm:$0xff]   ;;  %v501_v7 = vld [vmem:[%s675_s1 + $0x10] sm:$0xff]   ;;  %87 = vperm.xlu0 %495, %v53_v5  }
   0x3   :  { %460 = vmatpush3.bf16.msra.mxu0 %v497_v0  ;;  %463 = vmatprep.mubr.msk.bf16.mxu0 %vm127_vm0, %v499_v2  ;;  %v51_v6 = vld [vmem:[%s676_s2 + $0x20] sm:$0xff]  ;;  %v54_v8 = vld [vmem:[%s676_s2 + $0x38] sm:$0xff]  ;;  %v52_v9 = vld [vmem:[%s676_s2 + $0x28] sm:$0xff] }
   0x4   :  { %461 = vmatprep.subr.bf16.mxu0 %v498_v1  ;;  %77 = vperm.xlu1 %496, %v51_v6   ;;  %v49_v10 = vld [vmem:[%s676_s2 + $0x10] sm:$0xff]  ;;  %v50_v11 = vld [vmem:[%s676_s2 + $0x18] sm:$0xff] }
   0x6   :  { %92 = vperm.xlu0 %495, %v54_v8  }
   0x7   :  { %462 = vmatpush3.bf16.msra.mxu0 %v498_v1 }
   0x8   :  { %82 = vperm.xlu1 %496, %v52_v9  }
   0xa   :  { %464 = vmatmul.mubr.msk.bf16.vlgmr.msra.gmra.mxu0 %vm127_vm0, %v500_v4 }
   0xb   :  { %467 = vmatprep.mubr.msk.bf16.mxu0 %vm127_vm0, %v501_v7 }
   0xc   :  { %15 = vsyncpa [#allocation4], 0  ;;  %v502_v12 = vld [vmem:[%s675_s1 + $0x18] sm:$0xff]   ;;  %67 = vperm.xlu0 %495, %v49_v10   ;;  %72 = vperm.xlu1 %496, %v50_v11   ;;  %v47_v13 = vld [vmem:[%s676_s2] sm:$0xff]  ;;  %vm255_vm1 = vcmask 523264   ;;  %v533_v61 = vmov 0.0  }
   0xd   :  { %v48_v14 = vld [vmem:[%s676_s2 + $0x8] sm:$0xff]  ;;  %v223_v15 = vld [vmem:[%s678_s4 + $0x10] sm:$0xff]  ;;  %v224_v16 = vld [vmem:[%s678_s4 + $0x18] sm:$0xff]  ;;  %483 = vmatprep.subr.bf16.mxu0 %v533_v61  ;;  %vm534_vm2 = vmmov 0   ;;  %s535_s10 = smov [#allocation3]  }
   0xe   :  { %v221_v17 = vld [vmem:[%s678_s4] sm:$0xff]  ;;  %v222_v18 = vld [vmem:[%s678_s4 + $0x8] sm:$0xff]  ;;  %s420_s11 = sshll.u32 %s535_s10, 4  ;;  %s421_s11 = int_to_ptr.vmem [resolvable:$true] %s420_s11 }
   0xf   :  { %v319_v19 = vld [vmem:[%s680_s6] sm:$0xff]  ;;  %v320_v20 = vld [vmem:[%s680_s6 + $0x8] sm:$0xff]  ;;  %s510_s12 = scalar_lea.vmem %s421_s11, 16  ;;  %s514_s13 = scalar_lea.vmem %s421_s11, 32 }
  0x10   :  { %57 = vperm.xlu0 %495, %v47_v13   ;;  %62 = vperm.xlu1 %496, %v48_v14   ;;  %v382_v21 = vld [vmem:[%s681_s7] sm:$0xff]  ;;  %v383_v22 = vld [vmem:[%s681_s7 + $0x8] sm:$0xff]  ;;  %p511_p0 = scmp.ne.s32.totalorder %s421_s11, %s510_s12  ;;  %p515_p1 = scmp.lt.s32.totalorder %s421_s11, %s421_s11 }
  0x11   :  { %v503_v23 = vld [vmem:[%s677_s3] sm:$0xff]   ;;  %v504_v60 = vld [vmem:[%s677_s3 + $0x8] sm:$0xff]   ;;  %p516_p2 = scmp.lt.s32.totalorder %s514_s13, %s510_s12 }
  0x12   :  { %468 = vmatmul.mubr.msk.bf16.gmra.mxu0 %vm127_vm0, %v502_v12  ;;  %479 = vmatprep.mubr.msk.bf16.mxu1 %vm255_vm1, %v503_v23 }
  0x13   :  { %487 = vmatprep.mubr.msk.bf16.mxu0 %vm534_vm2, %v533_v61  ;;  %p517_p3 = por %p516_p2, %p515_p1 }
  0x14   :  { %237 = vperm.xlu0 %495, %v223_v15   ;;  %242 = vperm.xlu1 %496, %v224_v16   ;;  %v505_v16 = vld [vmem:[%s679_s5] sm:$0xff]  }
  0x15   :  { %p518_p4 = pnand %p517_p3, %p511_p0 }
  0x18   :  { %227 = vperm.xlu0 %495, %v221_v17   ;;  %232 = vperm.xlu1 %496, %v222_v18  }
  0x1c   :  { %323 = vperm.xlu0 %495, %v319_v19   ;;  %328 = vperm.xlu1 %496, %v320_v20  }
  0x20   :  { %386 = vperm.xlu0 %495, %v382_v21   ;;  %391 = vperm.xlu1 %496, %v383_v22  }
  0x7d   :  { %v88_v26 = vpop.permute.xlu0 %87 }
  0x7f   :  { %v78_v24 = vpop.permute.xlu1 %77 }
  0x81   :  { %v93_v31 = vpop.permute.xlu0 %92 }
  0x83   :  { %v83_v29 = vpop.permute.xlu1 %82 }
  0x87   :  { %v73_v35 = vpop.permute.xlu1 %72  ;;  %v68_v39 = vpop.permute.xlu0 %67 }
  0x8b   :  { %v63_v49 = vpop.permute.xlu1 %62  ;;  %v58_v53 = vpop.permute.xlu0 %57 }
  0x8f   :  { %v238_v62 = vpop.permute.xlu0 %237  ;;  %v243_v63 = vpop.permute.xlu1 %242 }
  0x93   :  { %v228_v4 = vpop.permute.xlu0 %227  ;;  %v233_v6 = vpop.permute.xlu1 %232 }
  0x97   :  { %v324_v17 = vpop.permute.xlu0 %323  ;;  %v329_v20 = vpop.permute.xlu1 %328 }
  0xca   :  { %v465_v25 = vpop.f32.mrf.mxu0 }
  0xcb   :  { %v183_v45 = vadd.f32 %v465_v25, %v68_v39 }
  0xcc   :  { %v174_v27 = vpop.f32.mrf.mxu0 }
  0xcd   :  { %v207_v54 = vmax.f32 %v183_v45, 0.0  ;;  %v175_v55 = vadd.f32 %v174_v27, %v58_v53  ;;  %v387_v27 = vpop.permute.xlu0 %386 }
  0xce   :  { %v466_v28 = vpop.f32.mrf.mxu0 }
  0xcf   :  { %v186_v41 = vadd.f32 %v466_v28, %v73_v35  ;;  %v205_v58 = vmax.f32 %v175_v55, 0.0  ;;  %v392_v28 = vpop.permute.xlu1 %391 }
  0xd0   :  { %v177_v30 = vpop.f32.mrf.mxu0 }
  0xd1   :  { %v208_v50 = vmax.f32 %v186_v41, 0.0  ;;  %v178_v51 = vadd.f32 %v177_v30, %v63_v49 }
  0xd2   :  { %v469_v32 = vpop.f32.mrf.mxu0 }
  0xd3   :  { %v199_v34 = vadd.f32 %v469_v32, %v88_v26  ;;  %v218_v56 = vpack.c.bf16 %v208_v50, %v207_v54  ;;  %v206_v57 = vmax.f32 %v178_v51, 0.0 }
  0xd4   :  { %v190_v33 = vpop.f32.mrf.mxu0 }
  0xd5   :  { %v191_v37 = vadd.f32 %v190_v33, %v78_v24  ;;  %v211_v42 = vmax.f32 %v199_v34, 0.0  ;;  %v217_v59 = vpack.c.bf16 %v206_v57, %v205_v58 }
  0xd6   :  { %v470_v36 = vpop.f32.mrf.mxu0 }
  0xd7   :  { %v202_v38 = vadd.f32 %v470_v36, %v93_v31  ;;  %v209_v46 = vmax.f32 %v191_v37, 0.0  ;;  %v404_v37 = vstv %s682_s8 }
  0xd8   :  { %v193_v40 = vpop.f32.mrf.mxu0 }
  0xd9   :  { %v212_v43 = vmax.f32 %v202_v38, 0.0  ;;  %v194_v44 = vadd.f32 %v193_v40, %v83_v29 }
  0xdb   :  { %v210_v47 = vmax.f32 %v194_v44, 0.0  ;;  %v220_v48 = vpack.c.bf16 %v212_v43, %v211_v42 }
  0xdd   :  { %v219_v52 = vpack.c.bf16 %v210_v47, %v209_v46  ;;  %471 = vmatprep.subr.bf16.mxu1 %v220_v48 }
  0xde   :  { %472 = vmatpush3.bf16.msra.mxu1 %v220_v48 }
  0xdf   :  { %473 = vmatprep.subr.bf16.mxu1 %v219_v52 }
  0xe2   :  { %474 = vmatpush3.bf16.msra.mxu1 %v219_v52 }
  0xe3   :  { %475 = vmatprep.subr.bf16.mxu1 %v218_v56 }
  0xe6   :  { %476 = vmatpush3.bf16.msra.mxu1 %v218_v56 }
  0xe7   :  { %477 = vmatprep.subr.bf16.mxu1 %v217_v59 }
  0xea   :  { %478 = vmatpush3.bf16.msra.mxu1 %v217_v59 }
  0xed   :  { %480 = vmatmul.mubr.msk.bf16.vlgmr.msra.gmra.mxu1 %vm255_vm1, %v504_v60 }
 0x1ad   :  { %v481_v0 = vpop.f32.mrf.mxu1 }
 0x1ae   :  { %v305_v2 = vadd.f32 %v481_v0, %v238_v62 }
 0x1af   :  { %v296_v1 = vpop.f32.mrf.mxu1 }
 0x1b0   :  { %v313_v8 = vmax.f32 %v305_v2, 0.0  ;;  %v297_v9 = vadd.f32 %v296_v1, %v228_v4 }
 0x1b1   :  { %v482_v3 = vpop.f32.mrf.mxu1 }
 0x1b2   :  { %v308_v5 = vadd.f32 %v482_v3, %v243_v63  ;;  %v311_v14 = vmax.f32 %v297_v9, 0.0 }
 0x1b3   :  { %v299_v7 = vpop.f32.mrf.mxu1 }
 0x1b4   :  { %v314_v10 = vmax.f32 %v308_v5, 0.0  ;;  %v300_v11 = vadd.f32 %v299_v7, %v233_v6 }
 0x1b6   :  { %v318_v12 = vpack.c.bf16 %v314_v10, %v313_v8  ;;  %v312_v13 = vmax.f32 %v300_v11, 0.0 }
 0x1b8   :  { %484 = vmatpush3.bf16.msra.mxu0 %v318_v12  ;;  %v317_v15 = vpack.c.bf16 %v312_v13, %v311_v14 }
 0x1b9   :  { %485 = vmatprep.subr.bf16.mxu0 %v533_v61 }
 0x1bc   :  { %486 = vmatpush3.bf16.msra.mxu0 %v317_v15 }
 0x1bf   :  { %488 = vmatmul.mubr.msk.bf16.vlgmr.msra.gmra.mxu0 %vm127_vm0, %v505_v16 }
 0x27f   :  { %v373_v18 = vpop.f32.mrf.mxu0 }
 0x280   :  { %v374_v19 = vadd.f32 %v373_v18, %v324_v17 }
 0x281   :  { %v489_v21 = vpop.f32.mrf.mxu0 }
 0x282   :  { %v380_v23 = vmax.f32 %v374_v19, 0.0 }
 0x283   :  { %v376_v22 = vpop.f32.mrf.mxu0 }
 0x284   :  { %v377_v24 = vadd.f32 %v376_v22, %v329_v20  ;;  %v394_v29 = vmul.f32 %v387_v27, %v380_v23 }
 0x285   :  { %v490_v25 = vpop.f32.mrf.mxu0 }
 0x286   :  { %v381_v26 = vmax.f32 %v377_v24, 0.0 }
 0x288   :  { %v395_v30 = vmul.f32 %v392_v28, %v381_v26 }
 0x28a   :  { %v396_v31 = vadd.f32 %v395_v30, %v394_v29 }
 0x28c   :  { %v397_v32 = vrot.slane %v396_v31, 4 }
 0x28e   :  { %v398_v33 = vadd.f32 %v397_v32, %v396_v31 }
 0x290   :  { %v399_v34 = vrot.slane %v398_v33, 2 }
 0x292   :  { %v400_v35 = vadd.f32 %v399_v34, %v398_v33 }
 0x294   :  { %v401_v36 = vrot.slane %v400_v35, 1 }
 0x296   :  { %v402_v38 = vadd.f32 %v401_v36, %v400_v35 }
 0x298   :  { %v405_v39 = vadd.f32 %v404_v37, %v402_v38 }
 0x29a   :  { %v406_v40 = vsub.f32 0.0, %v405_v39 }
 0x29c   :  { %v407_v41 = vmul.f32 1.442695, %v406_v40 }
 0x29e   :  { %506 = vpow2.f32 %v407_v41 }
 0x2ab   :  { %v507_v42 = vpop.eup %506 }
 0x2ac   :  { %v409_v43 = vadd.f32 1.0, %v507_v42 }
 0x2ae   :  { %508 = vrcp.f32 %v409_v43 }
 0x2bb   :  { %v509_v44 = vpop.eup %508 }
 0x2bc   :  { %v411_v45 = vmax.f32 %v509_v44, 0.0 }
 0x2be   :  { %v412_v46 = vmin.f32 %v411_v45, 1.0 }
 0x2c0   :  { %413 = vst [vmem:[#allocation3] sm:$0x1] %v412_v46 }
 0x2c1   :  { %521 = shalt.err (!%p518_p4)
}
 0x2c2   :  { %423 = dma.vmem_to_hbm [thread:$0]  %s421_s11, 16, %s683_s9, [#allocation4]  }
 0x2c3   :  { %530 = dma.done.wait [#allocation4], 16  }
 0x2c4   :  { %531 = vsyncadd [#allocation4], 4294967280 }
 0x2c5   :  { %427 = vsyncpa [#allocation4], 1 }

</bundles_post_ra>
